<compile_context>
chip_gen: v7x
topology: tpu7x:2x2x1
jax: 0.10.0
libtpu: 0.0.40
codegen_flags: <defaults>
</compile_context>

<pallas_src>
import functools

import jax
import jax.numpy as jnp
from jax.experimental import pallas as pl
from jax.experimental.pallas import tpu as pltpu


def _deconv_bn_relu_kernel(w_ref, x_ref, shift_ref, o_ref):
    # (R, Cin) @ (Cin, tm) -> (R, tm), f32 accumulation on the MXU.
    acc = jnp.dot(w_ref[...], x_ref[...], preferred_element_type=jnp.float32)
    # BN scale already folded into w; add (conv bias + BN shift), then ReLU.
    y = jnp.maximum(acc + shift_ref[...], 0.0)
    o_ref[...] = y.astype(o_ref.dtype)


@functools.partial(jax.jit, static_argnames=("eps", "tm"))
def upsample3d_block(x, w_ct, bias, gamma, beta, running_mean, running_var,
                     eps=1e-5, tm=2048):
    """x: (N, Cin, D, H, W); w_ct: (Cin, Cout, 2, 2, 2) (PyTorch ConvTranspose3d layout).

    Returns (N, Cout, 2D, 2H, 2W), matching
        ReLU(BatchNorm3d(ConvTranspose3d(x, k=2, s=2)))   (BN in eval mode).
    """
    N, Cin, D, H, W = x.shape
    Cout = w_ct.shape[1]
    R = 8 * Cout                 # rows = (co, kd, kh, kw)
    S = D * H * W                # flattened input voxels (lane axis)

    # --- voxel-axis tile size: big, lane-aligned, no padding copy needed ----
    if tm >= S:
        tm = S                                   # single full-extent tile
    elif tm % 128 != 0:
        tm = max(128, (tm // 128) * 128)
        if tm >= S:
            tm = S
    grid = (N, pl.cdiv(S, tm))

    # Free reshape: x stays in its native NC(DHW) layout, voxels contiguous.
    x3 = x.reshape(N, Cin, S)

    # (Cin, Cout, kd, kh, kw) -> (Cout, kd, kh, kw, Cin) -> (R, Cin); row = co*8 + tap.
    w_t = jnp.transpose(w_ct, (1, 2, 3, 4, 0)).reshape(R, Cin).astype(jnp.float32)

    # Eval-mode BN folded into per-row scale/shift (conv bias included in shift).
    inv_std = 1.0 / jnp.sqrt(running_var.astype(jnp.float32) + eps)
    scale_c = gamma.astype(jnp.float32) * inv_std                         # (Cout,)
    shift_c = beta.astype(jnp.float32) + (bias.astype(jnp.float32)
                                          - running_mean.astype(jnp.float32)) * scale_c
    scale_r = jnp.repeat(scale_c, 8)              # row = co*8 + tap -> scale_c[co]
    shift_r = jnp.repeat(shift_c, 8)
    w_scaled = w_t * scale_r[:, None]             # fold BN scale into weights
    shift = shift_r.reshape(R, 1)

    y_mat = pl.pallas_call(
        _deconv_bn_relu_kernel,
        out_shape=jax.ShapeDtypeStruct((N, R, S), x.dtype),
        grid_spec=pltpu.PrefetchScalarGridSpec(
            num_scalar_prefetch=0,
            grid=grid,
            in_specs=[
                pl.BlockSpec((R, Cin), lambda n, s: (0, 0)),            # fused weights (resident)
                pl.BlockSpec((None, Cin, tm), lambda n, s: (n, 0, s)),  # x voxels, native layout
                pl.BlockSpec((R, 1), lambda n, s: (0, 0)),              # BN shift (+conv bias)
            ],
            out_specs=pl.BlockSpec((None, R, tm), lambda n, s: (n, 0, s)),  # lane-dense store
        ),
        compiler_params=pltpu.CompilerParams(
            dimension_semantics=("parallel", "parallel")),
    )(w_scaled, x3, shift)

    # --- glue: interleave taps back into the upsampled NCDHW volume ---------
    # TODO(synk): this transpose of the 8x-sized output is the one remaining
    # wrapper layout pass; consumers that accept the tap-blocked
    # (N, Cout, 2,2,2, D,H,W) layout can skip it entirely.
    y = y_mat.reshape(N, Cout, 2, 2, 2, D, H, W)
    y = jnp.transpose(y, (0, 1, 5, 2, 6, 3, 7, 4))   # (N, Cout, D,kd, H,kh, W,kw)
    y = y.reshape(N, Cout, 2 * D, 2 * H, 2 * W)
    return y


def _reference(x, w_ct, bias, gamma, beta, running_mean, running_var, eps=1e-5):
    """Pure-JAX reference of the same forward (eval-mode BN)."""
    N, Cin, D, H, W = x.shape
    Cout = w_ct.shape[1]
    conv = jnp.einsum('ncdhw,coijk->nodihjwk', x.astype(jnp.float32),
                      w_ct.astype(jnp.float32))
    conv = conv.reshape(N, Cout, 2 * D, 2 * H, 2 * W)
    conv = conv + bias[None, :, None, None, None]
    inv_std = 1.0 / jnp.sqrt(running_var + eps)
    bn = (conv - running_mean[None, :, None, None, None]) * \
         (gamma * inv_std)[None, :, None, None, None] + beta[None, :, None, None, None]
    return jnp.maximum(bn, 0.0)


if __name__ == "__main__":
    # Small shapes consistent with the module: Upsample3DBlock(in_planes=4, out_planes=8, 2, 2)
    N, Cin, Cout = 2, 4, 8
    D = H = W = 8

    key = jax.random.PRNGKey(0)
    k_x, k_w, k_b, k_g, k_be, k_m, k_v = jax.random.split(key, 7)

    x = jax.random.normal(k_x, (N, Cin, D, H, W), dtype=jnp.float32)
    # ConvTranspose3d weight layout: (in_planes, out_planes, kD, kH, kW)
    w_ct = 0.1 * jax.random.normal(k_w, (Cin, Cout, 2, 2, 2), dtype=jnp.float32)
    bias = 0.1 * jax.random.normal(k_b, (Cout,), dtype=jnp.float32)
    gamma = 1.0 + 0.1 * jax.random.normal(k_g, (Cout,), dtype=jnp.float32)
    beta = 0.1 * jax.random.normal(k_be, (Cout,), dtype=jnp.float32)
    running_mean = 0.1 * jax.random.normal(k_m, (Cout,), dtype=jnp.float32)
    running_var = jnp.abs(jax.random.normal(k_v, (Cout,), dtype=jnp.float32)) + 0.5

    out = upsample3d_block(x, w_ct, bias, gamma, beta, running_mean, running_var)
    out = jax.block_until_ready(out)

    ref = _reference(x, w_ct, bias, gamma, beta, running_mean, running_var)
    assert out.shape == (N, Cout, 2 * D, 2 * H, 2 * W), out.shape
    assert jnp.allclose(out, ref, atol=1e-4, rtol=1e-4), float(jnp.max(jnp.abs(out - ref)))

    print("KERNEL_OK")
</pallas_src>

<mosaic_0001>
module attributes {stable_mosaic.version = 11 : i64} {
  func.func @_deconv_bn_relu_kernel(%arg0: i32, %arg1: i32, %arg2: memref<64x4xf32, #tpu.memory_space<vmem>>, %arg3: memref<1x4x512xf32, #tpu.memory_space<vmem>>, %arg4: memref<64x1xf32, #tpu.memory_space<vmem>>, %arg5: memref<1x64x512xf32, #tpu.memory_space<vmem>>) attributes {dimension_semantics = [#tpu.dimension_semantics<parallel>, #tpu.dimension_semantics<parallel>], iteration_bounds = array<i64: 2, 1>, scalar_prefetch = 0 : i64, scratch_operands = 0 : i64, tpu.core_type = #tpu.core_type<tc>, window_params = [{pipeline_mode = #tpu.pipeline_mode<synchronous>, transform_indices = @transform_0, window_bounds = array<i64: 64, 4>}, {transform_indices = @transform_1, window_bounds = array<i64: 1, 4, 512>}, {pipeline_mode = #tpu.pipeline_mode<synchronous>, transform_indices = @transform_2, window_bounds = array<i64: 64, 1>}, {transform_indices = @transform_3, window_bounds = array<i64: 1, 64, 512>}]} {
    %c0 = arith.constant 0 : index
    %c0_0 = arith.constant 0 : index
    %0 = vector.load %arg2[%c0, %c0_0] : memref<64x4xf32, #tpu.memory_space<vmem>>, vector<64x4xf32>
    %c0_1 = arith.constant 0 : index
    %c0_2 = arith.constant 0 : index
    %c0_3 = arith.constant 0 : index
    %1 = vector.load %arg3[%c0_1, %c0_2, %c0_3] : memref<1x4x512xf32, #tpu.memory_space<vmem>>, vector<1x4x512xf32>
    %2 = vector.shape_cast %1 : vector<1x4x512xf32> to vector<4x512xf32>
    %cst = arith.constant dense<0.000000e+00> : vector<64x512xf32>
    %3 = tpu.matmul %0, %2, %cst {dimension_numbers = #tpu.dot_dimension_numbers<[1], [0], [0], [1], [0, 0, 1, 1], [], []>} : vector<64x4xf32>, vector<4x512xf32>, vector<64x512xf32> -> vector<64x512xf32>
    %c0_4 = arith.constant 0 : index
    %c0_5 = arith.constant 0 : index
    %4 = vector.load %arg4[%c0_4, %c0_5] : memref<64x1xf32, #tpu.memory_space<vmem>>, vector<64x1xf32>
    %5 = vector.broadcast %4 : vector<64x1xf32> to vector<64x512xf32>
    %6 = arith.addf %3, %5 : vector<64x512xf32>
    %cst_6 = arith.constant 0.000000e+00 : f32
    %7 = vector.broadcast %cst_6 : f32 to vector<64x512xf32>
    %8 = arith.maximumf %6, %7 : vector<64x512xf32>
    %c0_7 = arith.constant 0 : index
    %c0_8 = arith.constant 0 : index
    %c0_9 = arith.constant 0 : index
    %9 = vector.load %arg5[%c0_7, %c0_8, %c0_9] : memref<1x64x512xf32, #tpu.memory_space<vmem>>, vector<1x64x512xf32>
    %10 = vector.shape_cast %9 : vector<1x64x512xf32> to vector<64x512xf32>
    %11 = vector.shape_cast %8 : vector<64x512xf32> to vector<1x64x512xf32>
    tpu.vector_store %arg5[%c0_7, %c0_8, %c0_9], %11 {strides = array<i32>} : memref<1x64x512xf32, #tpu.memory_space<vmem>>, vector<1x64x512xf32>,
    return
  }
  func.func @transform_0(%arg0: i32, %arg1: i32) -> (i32, i32) {
    %c0_i32 = arith.constant 0 : i32
    %c0_i32_0 = arith.constant 0 : i32
    %c0_i32_1 = arith.constant 0 : i32
    return %c0_i32, %c0_i32_0 : i32, i32
  }
  func.func @transform_1(%arg0: i32, %arg1: i32) -> (i32, i32, i32) {
    %c0_i32 = arith.constant 0 : i32
    %c0_i32_0 = arith.constant 0 : i32
    return %arg0, %c0_i32, %arg1 : i32, i32, i32
  }
  func.func @transform_2(%arg0: i32, %arg1: i32) -> (i32, i32) {
    %c0_i32 = arith.constant 0 : i32
    %c0_i32_0 = arith.constant 0 : i32
    %c0_i32_1 = arith.constant 0 : i32
    return %c0_i32, %c0_i32_0 : i32, i32
  }
  func.func @transform_3(%arg0: i32, %arg1: i32) -> (i32, i32, i32) {
    %c0_i32 = arith.constant 0 : i32
    %c0_i32_0 = arith.constant 0 : i32
    return %arg0, %c0_i32, %arg1 : i32, i32, i32
  }
}

</mosaic_0001>

<bundles_post_ra>
// kernel: mul.9
= control target key start
LH: loop header
LB: loop body
LE: loop exit
PB: predicated region body
PF: predicated region fallthrough
CT: control target
= control target key end

     0   :  { %s67_s10 = smov 56   ;;  %s68_s11 = smov 40   ;;  %vm3_vm0 = vcmask 64512   ;;  %vm9_vm1 = vcmask 523712   ;;  %vm15_vm2 = vcmask 458112   ;;  %vm21_vm3 = vcmask 392512   ;;  %s111_s0 = inlined_call_operand.vmem [shape: f32[8,8], index: 0, kind: input, shape index: {}]   ;;  %s112_s1 = inlined_call_operand.vmem [shape: f32[64], index: 1, kind: output, shape index: {}]  }
   0x1   :  { %v53_v0 = vld [vmem:[%s111_s0 + $0x7] sm:$0x1]   ;;  %v55_v1 = vld [vmem:[%s111_s0 + $0x5] sm:$0x1]   ;;  %v54_v2 = vld [vmem:[%s111_s0 + $0x6] sm:$0x1]  }
   0x2   :  { %7 = vrot.lane.b32.xlu0 %v53_v0, %s67_s10  ;;  %19 = vrot.lane.b32.xlu1 %v55_v1, %s68_s11  ;;  %v56_v3 = vld [vmem:[%s111_s0 + $0x4] sm:$0x1]   ;;  %v2_v4 = vld [vmem:[%s111_s0] sm:$0x1]   ;;  %s69_s18 = smov 48   ;;  %s70_s19 = smov 32  }
   0x3   :  { %4 = vst.msk [vmem:[#allocation0] sm:$0x1] %vm3_vm0, %v2_v4   ;;  %v57_v5 = vld [vmem:[%s111_s0 + $0x3] sm:$0x1]   ;;  %v58_v6 = vld [vmem:[%s111_s0 + $0x2] sm:$0x1]  }
   0x4   :  { %s71_s24 = smov 24   ;;  %s72_s25 = smov 16   ;;  %v59_v7 = vld [vmem:[%s111_s0 + $0x1] sm:$0x1]   ;;  %vm27_vm4 = vcmask 326912   ;;  %vm33_vm5 = vcmask 261312  }
   0x5   :  { %s73_s0 = smov 8   ;;  %vm39_vm6 = vcmask 195712   ;;  %vm45_vm7 = vcmask 130112  }
   0x6   :  { %13 = vrot.lane.b32.xlu0 %v54_v2, %s69_s18  ;;  %25 = vrot.lane.b32.xlu1 %v56_v3, %s70_s19 }
   0xa   :  { %31 = vrot.lane.b32.xlu0 %v57_v5, %s71_s24  ;;  %37 = vrot.lane.b32.xlu1 %v58_v6, %s72_s25 }
   0xe   :  { %43 = vrot.lane.b32.xlu0 %v59_v7, %s73_s0 }
  0x74   :  { %v8_v8 = vpop.permute.xlu0 %7   ;;  %v20_v9 = vpop.permute.xlu1 %19  }
  0x75   :  { %10 = vst.msk [vmem:[#allocation0] sm:$0x1] %vm9_vm1, %v8_v8  }
  0x78   :  { %v14_v10 = vpop.permute.xlu0 %13   ;;  %v26_v11 = vpop.permute.xlu1 %25  }
  0x79   :  { %16 = vst.msk [vmem:[#allocation0] sm:$0x1] %vm15_vm2, %v14_v10  }
  0x7a   :  { %22 = vst.msk [vmem:[#allocation0] sm:$0x1] %vm21_vm3, %v20_v9  }
  0x7b   :  { %28 = vst.msk [vmem:[#allocation0] sm:$0x1] %vm27_vm4, %v26_v11  }
  0x7c   :  { %v32_v12 = vpop.permute.xlu0 %31   ;;  %v38_v13 = vpop.permute.xlu1 %37  }
  0x7d   :  { %34 = vst.msk [vmem:[#allocation0] sm:$0x1] %vm33_vm5, %v32_v12  }
  0x7e   :  { %40 = vst.msk [vmem:[#allocation0] sm:$0x1] %vm39_vm6, %v38_v13  }
  0x80   :  { %v44_v14 = vpop.permute.xlu0 %43  }
  0x81   :  { %46 = vst.msk [vmem:[#allocation0] sm:$0x1] %vm45_vm7, %v44_v14  }
  0x88   :  { %v50_v15 = vld [vmem:[#allocation0] sm:$0x1] }
  0x89   :  { %52 = vst [vmem:[%s112_s1] sm:$0x1] %v50_v15 }

// kernel: upsample3d_block.1
= control target key start
LH: loop header
LB: loop body
LE: loop exit
PB: predicated region body
PF: predicated region fallthrough
CT: control target
= control target key end

     0   :  { %s792_s12 = smov 0   ;;  %s794_s13 = smov 0   ;;  %s943_s0 = inlined_call_operand.vmem [shape: f32[64,4], index: 0, kind: input, shape index: {}]   ;;  %s944_s1 = inlined_call_operand.vmem [shape: f32[2,4,512], index: 1, kind: input, shape index: {}]   ;;  %s945_s2 = inlined_call_operand.vmem [shape: f32[64,1], index: 2, kind: input, shape index: {}]   ;;  %s946_s3 = inlined_call_operand.vmem [shape: f32[2,64,512], index: 3, kind: output, shape index: {}]  }
   0x1   :  { %s796_s14 = smov 0  }
   0x2 LB: > { %s25_s15 = sadd.s32 1, %s764_s13  ;;  %p687_p0 = scmp.ge.s32.totalorder %s768_s14, 1  ;;  %s768_s14 = sphi %s796_s14, %s13_s14   ;;  %s764_s13 = sphi %s794_s13, %s948_s13   ;;  %s760_s12 = sphi %s792_s12, %s947_s12  }
   0x3   : > { %p27_p1 = scmp.ge.s32.totalorder %s25_s15, 2  ;;  %p158_p2 = scmp.lt.s32.totalorder %s768_s14, 3 }
   0x5   : > { %s950_s15 = smov (%p27_p1, %s25_s15), 0  ;;  %p159_p3 = pnand %p687_p0, %p158_p2 }
   0x6   : > { %p191_p4 = scmp.lt.s32.totalorder (!%p159_p3), %s760_s12, 1  ;;  %v770_v0 = vmov (!%p159_p3), 0.0   ;;  %v771_v1 = vmov (!%p159_p3), 0   ;;  %v220_v2 = vld [vmem:[%s945_s2] sm:$0xff] (!%p159_p3)  ;;  %v222_v3 = vld [vmem:[%s945_s2 + $0x10] sm:$0xff] (!%p159_p3)  ;;  %v221_v4 = vld [vmem:[%s945_s2 + $0x8] sm:$0xff] (!%p159_p3) }
   0x7   : > { %162 = sbr.rel (%p159_p3) target bundleno = 268 (0x10c), region = 32  ;;  %370 = vmatprep.mubr.f32.mxu0 (!%p159_p3), %v770_v0  ;;  %483 = vmatprep.mubr.f32.mxu1 (!%p159_p3), %v770_v0  ;;  %v223_v5 = vld [vmem:[%s945_s2 + $0x18] sm:$0xff] (!%p159_p3)  ;;  %vm297_vm0 = vcmask (!%p159_p3), 1043456   ;;  %v210_v10 = vld [vmem:[%s943_s0] sm:$0xff] (!%p159_p3)  ;;  %vm272_vm1 = vcmask (!%p159_p3), 31744   ;;  %v225_v11 = vld [vmem:[%s945_s2 + $0x28] sm:$0xff] (!%p159_p3) }
   0x8   : > { %742 = vset.pattern.permute.xlu0 (!%p159_p3), %v771_v1  ;;  %743 = vset.pattern.permute.xlu1 (!%p159_p3), %v771_v1  ;;  %v224_v12 = vld [vmem:[%s945_s2 + $0x20] sm:$0xff] (!%p159_p3)  ;;  %v211_v13 = vld [vmem:[%s943_s0 + $0x8] sm:$0xff] (!%p159_p3)  ;;  %v227_v14 = vld [vmem:[%s945_s2 + $0x38] sm:$0xff] (!%p159_p3) }
   0x9   : > { %230 = vperm.xlu0 (!%p159_p3), %742, %v220_v2   ;;  %240 = vperm.xlu1 (!%p159_p3), %743, %v222_v3   ;;  %v226_v15 = vld [vmem:[%s945_s2 + $0x30] sm:$0xff] (!%p159_p3)  ;;  %v213_v17 = vld [vmem:[%s943_s0 + $0x18] sm:$0xff] (!%p159_p3)  ;;  %v214_v18 = vld [vmem:[%s943_s0 + $0x20] sm:$0xff] (!%p159_p3) }
   0xa   : > { %v212_v16 = vld [vmem:[%s943_s0 + $0x10] sm:$0xff] (!%p159_p3)  ;;  %v215_v19 = vld [vmem:[%s943_s0 + $0x28] sm:$0xff] (!%p159_p3)  ;;  %v217_v21 = vld [vmem:[%s943_s0 + $0x38] sm:$0xff] (!%p159_p3) }
   0xb   : > { %v216_v20 = vld [vmem:[%s943_s0 + $0x30] sm:$0xff] (!%p159_p3) }
   0xd   : > { %235 = vperm.xlu0 (!%p159_p3), %742, %v221_v4   ;;  %245 = vperm.xlu1 (!%p159_p3), %743, %v223_v5  }
   0xe   : > { %s952_s12 = smov (!%p191_p4, %s760_s12), 1 }
   0xf   : > { %s714_s20 = sshll.u32 %s952_s12, 4  ;;  %s715_s29 = sshll.u32 %s952_s12, 8 }
  0x10   : > { %s198_s23 = scalar_lea.vmem %s944_s1, %s714_s20  ;;  %s900_s5 = scalar_lea.vmem %s946_s3, %s715_s29 }
  0x11   : > { %v218_v6 = vld [vmem:[%s198_s23] sm:$0xff]  ;;  %v219_v7 = vld [vmem:[%s198_s23 + $0x8] sm:$0xff]  ;;  %255 = vperm.xlu1 %743, %v225_v11   ;;  %250 = vperm.xlu0 %742, %v224_v12  }
  0x12   : > { %v270_v8 = vcombine.high %v218_v6, %v218_v6  ;;  %v271_v9 = vcombine.high %v219_v7, %v219_v7 }
  0x14   : > { %692 = vmatprep.subr.msk.mxu0 %vm297_vm0, %v270_v8  ;;  %702 = vmatprep.subr.msk.mxu1 %vm297_vm0, %v271_v9 }
  0x15   : > { %693 = vmatpush1.msk.msra.mxu0 %vm297_vm0, %v218_v6  ;;  %703 = vmatpush1.msk.msra.mxu1 %vm297_vm0, %v219_v7 }
  0x16   : > { %694 = vmatmul.mubr.msk.f32.vlgmr.msra.gmra.mrb[0].mxu0 %vm272_vm1, %v210_v10  ;;  %704 = vmatmul.mubr.msk.f32.vlgmr.msra.gmra.mrb[0].mxu1 %vm272_vm1, %v210_v10 }
  0x17   : > { %376 = vmatprep.mubr.f32.mxu0 %v770_v0  ;;  %489 = vmatprep.mubr.f32.mxu1 %v770_v0 }
  0x18   : > { %265 = vperm.xlu1 %743, %v227_v14   ;;  %260 = vperm.xlu0 %742, %v226_v15  }
  0x1a   : > { %695 = vmatmul.mubr.msk.f32.gmra.mrb[2].mxu0 %vm272_vm1, %v211_v13  ;;  %705 = vmatmul.mubr.msk.f32.gmra.mrb[2].mxu1 %vm272_vm1, %v211_v13 }
  0x1b   : > { %382 = vmatprep.mubr.f32.mxu0 %v770_v0  ;;  %495 = vmatprep.mubr.f32.mxu1 %v770_v0 }
  0x1e   : > { %696 = vmatmul.mubr.msk.f32.gmra.mrb[4].mxu0 %vm272_vm1, %v212_v16  ;;  %706 = vmatmul.mubr.msk.f32.gmra.mrb[4].mxu1 %vm272_vm1, %v212_v16 }
  0x1f   : > { %388 = vmatprep.mubr.f32.mxu0 %v770_v0  ;;  %501 = vmatprep.mubr.f32.mxu1 %v770_v0 }
  0x22   : > { %697 = vmatmul.mubr.msk.f32.gmra.mrb[6].mxu0 %vm272_vm1, %v213_v17  ;;  %707 = vmatmul.mubr.msk.f32.gmra.mrb[6].mxu1 %vm272_vm1, %v213_v17 }
  0x23   : > { %394 = vmatprep.mubr.f32.mxu0 %v770_v0  ;;  %507 = vmatprep.mubr.f32.mxu1 %v770_v0 }
  0x26   : > { %698 = vmatmul.mubr.msk.f32.gmra.mrb[8].mxu0 %vm272_vm1, %v214_v18  ;;  %708 = vmatmul.mubr.msk.f32.gmra.mrb[8].mxu1 %vm272_vm1, %v214_v18 }
  0x27   : > { %400 = vmatprep.mubr.f32.mxu0 %v770_v0  ;;  %513 = vmatprep.mubr.f32.mxu1 %v770_v0 }
  0x2a   : > { %699 = vmatmul.mubr.msk.f32.gmra.mrb[10].mxu0 %vm272_vm1, %v215_v19  ;;  %709 = vmatmul.mubr.msk.f32.gmra.mrb[10].mxu1 %vm272_vm1, %v215_v19 }
  0x2b   : > { %406 = vmatprep.mubr.f32.mxu0 %v770_v0  ;;  %519 = vmatprep.mubr.f32.mxu1 %v770_v0 }
  0x2e   : > { %700 = vmatmul.mubr.msk.f32.gmra.mrb[12].mxu0 %vm272_vm1, %v216_v20  ;;  %710 = vmatmul.mubr.msk.f32.gmra.mrb[12].mxu1 %vm272_vm1, %v216_v20 }
  0x2f   : > { %412 = vmatprep.mubr.f32.mxu0 %v770_v0  ;;  %525 = vmatprep.mubr.f32.mxu1 %v770_v0 }
  0x32   : > { %701 = vmatmul.mubr.msk.f32.gmra.mrb[14].mxu0 %vm272_vm1, %v217_v21  ;;  %711 = vmatmul.mubr.msk.f32.gmra.mrb[14].mxu1 %vm272_vm1, %v217_v21 }
  0x88   : > { %v231_v22 = vpop.permute.xlu0 %230  ;;  %v241_v34 = vpop.permute.xlu1 %240 }
  0x8c   : > { %v236_v31 = vpop.permute.xlu0 %235  ;;  %v246_v59 = vpop.permute.xlu1 %245 }
  0x90   : > { %v251_v8 = vpop.permute.xlu0 %250  ;;  %v256_v19 = vpop.permute.xlu1 %255 }
  0xe9   : > { %v372_v23 = vpop.f32.mrb[0].mxu0  ;;  %v485_v24 = vpop.f32.mrb[0].mxu1 }
  0xea   : > { %v373_v25 = vadd.f32 %v372_v23, %v231_v22  ;;  %v486_v26 = vadd.f32 %v485_v24, %v231_v22  ;;  %v374_v27 = vpop.f32.mrb[1].mxu0  ;;  %v487_v28 = vpop.f32.mrb[1].mxu1 }
  0xeb   : > { %v375_v29 = vadd.f32 %v374_v27, %v231_v22  ;;  %v488_v30 = vadd.f32 %v487_v28, %v231_v22 }
  0xec   : > { %v532_v32 = vmax.f32 %v373_v25, 0.0  ;;  %v534_v33 = vmax.f32 %v486_v26, 0.0 }
  0xed   : > { %v533_v35 = vmax.f32 %v375_v29, 0.0  ;;  %v535_v36 = vmax.f32 %v488_v30, 0.0  ;;  %v378_v37 = vpop.f32.mrb[2].mxu0  ;;  %v491_v38 = vpop.f32.mrb[2].mxu1 }
  0xee   : > { %564 = vst [vmem:[%s900_s5] sm:$0xff] %v532_v32  ;;  %566 = vst [vmem:[%s900_s5 + $0x10] sm:$0xff] %v534_v33  ;;  %v379_v39 = vadd.f32 %v378_v37, %v236_v31  ;;  %v492_v40 = vadd.f32 %v491_v38, %v236_v31  ;;  %v380_v41 = vpop.f32.mrb[3].mxu0  ;;  %v493_v42 = vpop.f32.mrb[3].mxu1 }
  0xef   : > { %565 = vst [vmem:[%s900_s5 + $0x8] sm:$0xff] %v533_v35  ;;  %567 = vst [vmem:[%s900_s5 + $0x18] sm:$0xff] %v535_v36  ;;  %v381_v43 = vadd.f32 %v380_v41, %v236_v31  ;;  %v494_v44 = vadd.f32 %v493_v42, %v236_v31  ;;  %v261_v32 = vpop.permute.xlu0 %260 }
  0xf0   : > { %v536_v45 = vmax.f32 %v379_v39, 0.0  ;;  %v538_v46 = vmax.f32 %v492_v40, 0.0 }
  0xf1   : > { %v537_v47 = vmax.f32 %v381_v43, 0.0  ;;  %v539_v48 = vmax.f32 %v494_v44, 0.0  ;;  %v384_v49 = vpop.f32.mrb[4].mxu0  ;;  %v497_v50 = vpop.f32.mrb[4].mxu1 }
  0xf2   : > { %568 = vst [vmem:[%s900_s5 + $0x20] sm:$0xff] %v536_v45  ;;  %570 = vst [vmem:[%s900_s5 + $0x30] sm:$0xff] %v538_v46  ;;  %v385_v51 = vadd.f32 %v384_v49, %v241_v34  ;;  %v498_v52 = vadd.f32 %v497_v50, %v241_v34  ;;  %v386_v53 = vpop.f32.mrb[5].mxu0  ;;  %v499_v54 = vpop.f32.mrb[5].mxu1 }
  0xf3   : > { %569 = vst [vmem:[%s900_s5 + $0x28] sm:$0xff] %v537_v47  ;;  %571 = vst [vmem:[%s900_s5 + $0x38] sm:$0xff] %v539_v48  ;;  %v387_v55 = vadd.f32 %v386_v53, %v241_v34  ;;  %v500_v56 = vadd.f32 %v499_v54, %v241_v34  ;;  %v266_v45 = vpop.permute.xlu1 %265 }
  0xf4   : > { %v540_v57 = vmax.f32 %v385_v51, 0.0  ;;  %v542_v58 = vmax.f32 %v498_v52, 0.0 }
  0xf5   : > { %v541_v60 = vmax.f32 %v387_v55, 0.0  ;;  %v543_v61 = vmax.f32 %v500_v56, 0.0  ;;  %v390_v62 = vpop.f32.mrb[6].mxu0  ;;  %v503_v63 = vpop.f32.mrb[6].mxu1 }
  0xf6   : > { %572 = vst [vmem:[%s900_s5 + $0x40] sm:$0xff] %v540_v57  ;;  %574 = vst [vmem:[%s900_s5 + $0x50] sm:$0xff] %v542_v58  ;;  %v391_v0 = vadd.f32 %v390_v62, %v246_v59  ;;  %v504_v1 = vadd.f32 %v503_v63, %v246_v59  ;;  %v392_v2 = vpop.f32.mrb[7].mxu0  ;;  %v505_v3 = vpop.f32.mrb[7].mxu1 }
  0xf7   : > { %573 = vst [vmem:[%s900_s5 + $0x48] sm:$0xff] %v541_v60  ;;  %575 = vst [vmem:[%s900_s5 + $0x58] sm:$0xff] %v543_v61  ;;  %v393_v4 = vadd.f32 %v392_v2, %v246_v59  ;;  %v506_v5 = vadd.f32 %v505_v3, %v246_v59 }
  0xf8   : > { %v544_v6 = vmax.f32 %v391_v0, 0.0  ;;  %v546_v7 = vmax.f32 %v504_v1, 0.0 }
  0xf9   : > { %v545_v9 = vmax.f32 %v393_v4, 0.0  ;;  %v547_v10 = vmax.f32 %v506_v5, 0.0  ;;  %v396_v11 = vpop.f32.mrb[8].mxu0  ;;  %v509_v12 = vpop.f32.mrb[8].mxu1 }
  0xfa   : > { %576 = vst [vmem:[%s900_s5 + $0x60] sm:$0xff] %v544_v6  ;;  %578 = vst [vmem:[%s900_s5 + $0x70] sm:$0xff] %v546_v7  ;;  %v397_v13 = vadd.f32 %v396_v11, %v251_v8  ;;  %v510_v14 = vadd.f32 %v509_v12, %v251_v8  ;;  %v398_v15 = vpop.f32.mrb[9].mxu0  ;;  %v511_v16 = vpop.f32.mrb[9].mxu1 }
  0xfb   : > { %577 = vst [vmem:[%s900_s5 + $0x68] sm:$0xff] %v545_v9  ;;  %579 = vst [vmem:[%s900_s5 + $0x78] sm:$0xff] %v547_v10  ;;  %v399_v17 = vadd.f32 %v398_v15, %v251_v8  ;;  %v512_v18 = vadd.f32 %v511_v16, %v251_v8 }
  0xfc   : > { %v548_v20 = vmax.f32 %v397_v13, 0.0  ;;  %v550_v21 = vmax.f32 %v510_v14, 0.0 }
  0xfd   : > { %v549_v22 = vmax.f32 %v399_v17, 0.0  ;;  %v551_v23 = vmax.f32 %v512_v18, 0.0  ;;  %v402_v24 = vpop.f32.mrb[10].mxu0  ;;  %v515_v25 = vpop.f32.mrb[10].mxu1 }
  0xfe   : > { %580 = vst [vmem:[%s900_s5 + $0x80] sm:$0xff] %v548_v20  ;;  %582 = vst [vmem:[%s900_s5 + $0x90] sm:$0xff] %v550_v21  ;;  %v403_v26 = vadd.f32 %v402_v24, %v256_v19  ;;  %v516_v27 = vadd.f32 %v515_v25, %v256_v19  ;;  %v404_v28 = vpop.f32.mrb[11].mxu0  ;;  %v517_v29 = vpop.f32.mrb[11].mxu1 }
  0xff   : > { %581 = vst [vmem:[%s900_s5 + $0x88] sm:$0xff] %v549_v22  ;;  %583 = vst [vmem:[%s900_s5 + $0x98] sm:$0xff] %v551_v23  ;;  %v405_v30 = vadd.f32 %v404_v28, %v256_v19  ;;  %v518_v31 = vadd.f32 %v517_v29, %v256_v19 }
 0x100   : > { %v552_v33 = vmax.f32 %v403_v26, 0.0  ;;  %v554_v34 = vmax.f32 %v516_v27, 0.0 }
 0x101   : > { %v553_v35 = vmax.f32 %v405_v30, 0.0  ;;  %v555_v36 = vmax.f32 %v518_v31, 0.0  ;;  %v408_v37 = vpop.f32.mrb[12].mxu0  ;;  %v521_v38 = vpop.f32.mrb[12].mxu1 }
 0x102   : > { %584 = vst [vmem:[%s900_s5 + $0xa0] sm:$0xff] %v552_v33  ;;  %586 = vst [vmem:[%s900_s5 + $0xb0] sm:$0xff] %v554_v34  ;;  %v409_v39 = vadd.f32 %v408_v37, %v261_v32  ;;  %v522_v40 = vadd.f32 %v521_v38, %v261_v32  ;;  %v410_v41 = vpop.f32.mrb[13].mxu0  ;;  %v523_v42 = vpop.f32.mrb[13].mxu1 }
 0x103   : > { %585 = vst [vmem:[%s900_s5 + $0xa8] sm:$0xff] %v553_v35  ;;  %587 = vst [vmem:[%s900_s5 + $0xb8] sm:$0xff] %v555_v36  ;;  %v411_v43 = vadd.f32 %v410_v41, %v261_v32  ;;  %v524_v44 = vadd.f32 %v523_v42, %v261_v32 }
 0x104   : > { %v556_v46 = vmax.f32 %v409_v39, 0.0  ;;  %v558_v47 = vmax.f32 %v522_v40, 0.0 }
 0x105   : > { %v557_v48 = vmax.f32 %v411_v43, 0.0  ;;  %v559_v49 = vmax.f32 %v524_v44, 0.0  ;;  %v414_v50 = vpop.f32.mrb[14].mxu0  ;;  %v527_v51 = vpop.f32.mrb[14].mxu1 }
 0x106   : > { %588 = vst [vmem:[%s900_s5 + $0xc0] sm:$0xff] %v556_v46  ;;  %590 = vst [vmem:[%s900_s5 + $0xd0] sm:$0xff] %v558_v47  ;;  %v415_v52 = vadd.f32 %v414_v50, %v266_v45  ;;  %v528_v53 = vadd.f32 %v527_v51, %v266_v45  ;;  %v416_v54 = vpop.f32.mrb[15].mxu0  ;;  %v529_v55 = vpop.f32.mrb[15].mxu1 }
 0x107   : > { %589 = vst [vmem:[%s900_s5 + $0xc8] sm:$0xff] %v557_v48  ;;  %591 = vst [vmem:[%s900_s5 + $0xd8] sm:$0xff] %v559_v49  ;;  %v417_v56 = vadd.f32 %v416_v54, %v266_v45  ;;  %v530_v57 = vadd.f32 %v529_v55, %v266_v45 }
 0x108   : > { %v560_v58 = vmax.f32 %v415_v52, 0.0  ;;  %v562_v59 = vmax.f32 %v528_v53, 0.0 }
 0x109   : > { %v561_v60 = vmax.f32 %v417_v56, 0.0  ;;  %v563_v61 = vmax.f32 %v530_v57, 0.0 }
 0x10a   : > { %592 = vst [vmem:[%s900_s5 + $0xe0] sm:$0xff] %v560_v58  ;;  %594 = vst [vmem:[%s900_s5 + $0xf0] sm:$0xff] %v562_v59 }
 0x10b   : > { %593 = vst [vmem:[%s900_s5 + $0xe8] sm:$0xff] %v561_v60  ;;  %595 = vst [vmem:[%s900_s5 + $0xf8] sm:$0xff] %v563_v61 }
 0x10c PF: > { %s13_s14 = sadd.s32 1, %s768_s14   ;;  %s947_s12 = smov %s764_s13 }
 0x10d   : > { %p10_p5 = scmp.ge.s32.totalorder %s13_s14, 4   ;;  %s948_s13 = smov %s950_s15 }
 0x10f   :  { %12 = sbr.rel (!%p10_p5) target bundleno = 2 (0x2), region = 62 }

</bundles_post_ra>
